<compile_context>
chip_gen: v7x
topology: tpu7x:2x2x1
jax: 0.10.0
libtpu: 0.0.40
codegen_flags: <defaults>
</compile_context>

<pallas_src>
import functools

import jax
import jax.numpy as jnp
from jax.experimental import pallas as pl
from jax.experimental.pallas import tpu as pltpu


# ------------------------------ VMEM budgeting --------------------------------
def _vmem_budgets():
    """(physical_vmem, scoped_vmem_limit, per_block_byte_target), per generation."""
    try:
        cap = int(pltpu.get_tpu_info().vmem_capacity_bytes)
    except Exception:  # pragma: no cover - conservative default (v7x per-core VMEM)
        cap = 64 * 1024 * 1024
    # Leave headroom for compiler scratch; 128 MiB parts -> ~96 MiB scoped,
    # 64 MiB parts (v7x) -> ~48 MiB scoped.
    vmem_limit = max(min(cap - 16 * 1024 * 1024, 96 * 1024 * 1024),
                     32 * 1024 * 1024)
    # Single-pass step holds: in block (double-buffered) + out block
    # (double-buffered) + f32 temporaries (~2-3 blocks) -> budget ~ limit/8.
    block_budget = min(vmem_limit // 8, 16 * 1024 * 1024)
    return cap, vmem_limit, block_budget


def _sublane(itemsize):
    return max(1, 32 // itemsize)   # f32 -> 8, bf16 -> 16, int8 -> 32


def _legal_channel_tiles(num_channels, itemsize):
    sub = _sublane(itemsize)
    return [tc for tc in range(1, num_channels + 1)
            if num_channels % tc == 0 and (tc % sub == 0 or tc == num_channels)]


def _pick_single_pass_tile(n, num_channels, lane_len, itemsize, block_budget):
    """Largest legal tc with N*tc*L bytes <= budget; prefer >=2 tiles (v7x 2 TCs)."""
    legal = _legal_channel_tiles(num_channels, itemsize)
    fitting = [tc for tc in legal if n * tc * lane_len * itemsize <= block_budget]
    if not fitting:
        return None
    multi = [tc for tc in fitting if num_channels // tc >= 2]
    return max(multi) if multi else max(fitting)


def _pick_two_pass_tile(num_channels, lane_len, itemsize, block_budget):
    legal = _legal_channel_tiles(num_channels, itemsize)
    fitting = [tc for tc in legal if tc * lane_len * itemsize <= block_budget]
    return max(fitting) if fitting else min(legal)


# --------------------------- single-pass main kernel ---------------------------
def _bn_single_pass_kernel(x_ref, w_ref, b_ref, y_ref, mean_ref, var_ref,
                           *, eps, inv_count):
    """One channel tile, all of (N, L) resident: stats + normalize in one pass."""
    x = x_ref[...].astype(jnp.float32)                                 # (N, tc, L)
    s = jnp.sum(jnp.sum(x, axis=2, keepdims=True), axis=0, keepdims=True)
    mean = s * inv_count                                               # (1, tc, 1)
    xc = x - mean                                                      # centered, in VMEM
    q = jnp.sum(jnp.sum(xc * xc, axis=2, keepdims=True), axis=0, keepdims=True)
    var = q * inv_count                                                # biased variance
    scale = w_ref[...][None] * jax.lax.rsqrt(var + eps)                # (1, tc, 1)
    y_ref[...] = (xc * scale + b_ref[...][None]).astype(y_ref.dtype)
    mean_ref[...] = mean[0]
    var_ref[...] = var[0]


# ------------------------------ two-pass fallback ------------------------------
def _partial_stats_kernel(x_ref, s_ref, q_ref):
    """Per-(batch, channel-tile) partial sum / sum-of-squares over the lane axis."""
    x = x_ref[...].astype(jnp.float32)                 # (1, tc, L)
    s_ref[...] = jnp.sum(x, axis=2, keepdims=True)     # (1, tc, 1)
    q_ref[...] = jnp.sum(x * x, axis=2, keepdims=True)


def _scale_shift_kernel(x_ref, scale_ref, shift_ref, y_ref):
    """y = x * scale + shift with per-channel scale/shift (broadcast FMA)."""
    x = x_ref[...].astype(jnp.float32)                 # (1, tc, L)
    y_ref[...] = (x * scale_ref[...] + shift_ref[...]).astype(y_ref.dtype)


# --------------------------------- wrapper ------------------------------------
def custom_batch_norm(x_nchw, weight, bias, running_mean, running_var,
                      *, eps=1e-5, momentum=0.1, donate_input=False,
                      force_two_pass=False):
    """Forward pass of CustomBatchNorm (training mode, batch statistics).

    Returns (output_nchw, new_running_mean, new_running_var).
    """
    N, C, H, W = x_nchw.shape
    L = H * W
    count = N * L
    out_dtype = x_nchw.dtype

    # Free layout change (no transpose, no data movement): NCHW -> (N, C, H*W).
    # H*W sits on the 128-wide lane axis -> lane-dense loads / unmasked stores.
    x3 = x_nchw.reshape(N, C, L)
    w2d = weight.reshape(C, 1).astype(jnp.float32)
    b2d = bias.reshape(C, 1).astype(jnp.float32)
    itemsize = x3.dtype.itemsize

    cap, vmem_limit, block_budget = _vmem_budgets()
    tc_sp = (None if force_two_pass
             else _pick_single_pass_tile(N, C, L, itemsize, block_budget))

    if tc_sp is not None:
        # ---- main path: single pass over x, gridded over channel tiles ----
        grid = (C // tc_sp,)
        y3, mean, var = pl.pallas_call(
            functools.partial(_bn_single_pass_kernel, eps=float(eps),
                              inv_count=1.0 / float(count)),
            out_shape=(jax.ShapeDtypeStruct((N, C, L), out_dtype),
                       jax.ShapeDtypeStruct((C, 1), jnp.float32),
                       jax.ShapeDtypeStruct((C, 1), jnp.float32)),
            grid=grid,
            in_specs=[pl.BlockSpec((N, tc_sp, L), lambda ci: (0, ci, 0)),
                      pl.BlockSpec((tc_sp, 1), lambda ci: (ci, 0)),
                      pl.BlockSpec((tc_sp, 1), lambda ci: (ci, 0))],
            out_specs=(pl.BlockSpec((N, tc_sp, L), lambda ci: (0, ci, 0)),
                       pl.BlockSpec((tc_sp, 1), lambda ci: (ci, 0)),
                       pl.BlockSpec((tc_sp, 1), lambda ci: (ci, 0))),
            compiler_params=pltpu.CompilerParams(
                dimension_semantics=("parallel",),
                vmem_limit_bytes=int(vmem_limit)),
            input_output_aliases=({0: 0} if donate_input else {}),
        )(x3, w2d, b2d)
    else:
        # ---- fallback: tiled two-pass path (stats kernel + glue + normalize) ----
        tc = _pick_two_pass_tile(C, L, itemsize, block_budget)
        block_bytes = tc * L * itemsize
        need = 6 * block_bytes + (1 << 20)   # in+out streams, double-buffered, slack
        vmem_limit_tp = int(min(max(vmem_limit, need), cap - 8 * 1024 * 1024))
        # TODO(synk): for extreme H*W where even tc == one sublane group exceeds
        # the block budget, also tile the lane axis instead of raising the limit.
        grid = (N, C // tc)

        # Pass 1: per-(batch, channel-tile) partial stats; both axes parallel so
        # v7x's two TensorCores split the reduction.
        partial_s, partial_q = pl.pallas_call(
            _partial_stats_kernel,
            out_shape=(jax.ShapeDtypeStruct((N, C, 1), jnp.float32),
                       jax.ShapeDtypeStruct((N, C, 1), jnp.float32)),
            grid=grid,
            in_specs=[pl.BlockSpec((1, tc, L), lambda n, ci: (n, ci, 0))],
            out_specs=(pl.BlockSpec((1, tc, 1), lambda n, ci: (n, ci, 0)),
                       pl.BlockSpec((1, tc, 1), lambda n, ci: (n, ci, 0))),
            compiler_params=pltpu.CompilerParams(
                dimension_semantics=("parallel", "parallel"),
                vmem_limit_bytes=vmem_limit_tp),
        )(x3)

        # Tiny cross-batch combine + affine folding (C elements of glue).
        mean = jnp.sum(partial_s, axis=0) / count                        # (C, 1)
        var = jnp.maximum(jnp.sum(partial_q, axis=0) / count - mean * mean, 0.0)
        scale = w2d * jax.lax.rsqrt(var + eps)                           # (C, 1)
        shift = b2d - mean * scale                                       # (C, 1)

        # Pass 2: y = x * scale + shift (single broadcast FMA per element).
        y3 = pl.pallas_call(
            _scale_shift_kernel,
            out_shape=jax.ShapeDtypeStruct((N, C, L), out_dtype),
            grid=grid,
            in_specs=[pl.BlockSpec((1, tc, L), lambda n, ci: (n, ci, 0)),
                      pl.BlockSpec((tc, 1), lambda n, ci: (ci, 0)),
                      pl.BlockSpec((tc, 1), lambda n, ci: (ci, 0))],
            out_specs=pl.BlockSpec((1, tc, L), lambda n, ci: (n, ci, 0)),
            compiler_params=pltpu.CompilerParams(
                dimension_semantics=("parallel", "parallel"),
                vmem_limit_bytes=vmem_limit_tp),
            input_output_aliases=({0: 0} if donate_input else {}),
        )(x3, scale, shift)

    # Free reshape back to NCHW (same memory layout).
    y_nchw = y3.reshape(N, C, H, W)

    # Running-stat update (glue, matches the PyTorch buffer update).
    # TODO(synk): if the real CustomBatchNorm uses the UNBIASED variance for the
    # running_var update (like nn.BatchNorm2d), scale var1 by count/(count-1).
    mean1 = mean.reshape(C)
    var1 = var.reshape(C)
    new_running_mean = (1.0 - momentum) * running_mean + momentum * mean1
    new_running_var = (1.0 - momentum) * running_var + momentum * var1
    return y_nchw, new_running_mean, new_running_var


# -------------------------------- reference -----------------------------------
def _reference(x, weight, bias, rm, rv, *, eps=1e-5, momentum=0.1):
    mean = jnp.mean(x, axis=(0, 2, 3))
    var = jnp.var(x, axis=(0, 2, 3))  # biased
    new_rm = (1.0 - momentum) * rm + momentum * mean
    new_rv = (1.0 - momentum) * rv + momentum * var
    xn = (x - mean[None, :, None, None]) / jnp.sqrt(var[None, :, None, None] + eps)
    y = weight[None, :, None, None] * xn + bias[None, :, None, None]
    return y, new_rm, new_rv


if __name__ == "__main__":
    # Matches the module: bn = norm_layer(64) operates on the conv's 64-channel
    # output; small spatial/batch for the test.
    N, C, H, W = 2, 64, 16, 16

    # Deterministic parameter init, matching the norm layer's __init__.
    weight = jnp.ones((C,), jnp.float32)
    bias = jnp.zeros((C,), jnp.float32)
    running_mean = jnp.zeros((C,), jnp.float32)
    running_var = jnp.ones((C,), jnp.float32)

    key = jax.random.PRNGKey(0)
    x = jax.random.normal(key, (N, C, H, W), dtype=jnp.float32)

    y_ref, rm_ref, rv_ref = _reference(
        x, weight, bias, running_mean, running_var, eps=1e-5, momentum=0.1)

    # Main single-pass channel-gridded path (>= 2 parallel channel tiles).
    y, rm, rv = custom_batch_norm(
        x, weight, bias, running_mean, running_var, eps=1e-5, momentum=0.1)
    y = jax.block_until_ready(y)
    assert jnp.allclose(y, y_ref, atol=1e-4, rtol=1e-4)
    assert jnp.allclose(rm, rm_ref, atol=1e-5, rtol=1e-5)
    assert jnp.allclose(rv, rv_ref, atol=1e-5, rtol=1e-5)

    # Two-pass fallback path (used only when the single-pass tile can't fit VMEM).
    y2, rm2, rv2 = custom_batch_norm(
        x, weight, bias, running_mean, running_var,
        eps=1e-5, momentum=0.1, force_two_pass=True)
    y2 = jax.block_until_ready(y2)
    assert jnp.allclose(y2, y_ref, atol=1e-4, rtol=1e-4)
    assert jnp.allclose(rm2, rm_ref, atol=1e-5, rtol=1e-5)
    assert jnp.allclose(rv2, rv_ref, atol=1e-5, rtol=1e-5)

    # TODO(synk): the surrounding TestModel's Conv2d/ReLU wrap this norm layer
    # and are outside the scope of this kernel.
    print("KERNEL_OK")
</pallas_src>

<mosaic_0001>
module attributes {stable_mosaic.version = 11 : i64} {
  func.func @_bn_single_pass_kernel(%arg0: i32, %arg1: memref<2x32x256xf32, #tpu.memory_space<vmem>>, %arg2: memref<32x1xf32, #tpu.memory_space<vmem>>, %arg3: memref<32x1xf32, #tpu.memory_space<vmem>>, %arg4: memref<2x32x256xf32, #tpu.memory_space<vmem>>, %arg5: memref<32x1xf32, #tpu.memory_space<vmem>>, %arg6: memref<32x1xf32, #tpu.memory_space<vmem>>) attributes {dimension_semantics = [#tpu.dimension_semantics<parallel>], iteration_bounds = array<i64: 2>, scalar_prefetch = 0 : i64, scratch_operands = 0 : i64, tpu.core_type = #tpu.core_type<tc>, window_params = [{transform_indices = @transform_0, window_bounds = array<i64: 2, 32, 256>}, {transform_indices = @transform_1, window_bounds = array<i64: 32, 1>}, {transform_indices = @transform_2, window_bounds = array<i64: 32, 1>}, {transform_indices = @transform_3, window_bounds = array<i64: 2, 32, 256>}, {transform_indices = @transform_4, window_bounds = array<i64: 32, 1>}, {transform_indices = @transform_5, window_bounds = array<i64: 32, 1>}]} {
    %c0 = arith.constant 0 : index
    %c0_0 = arith.constant 0 : index
    %c0_1 = arith.constant 0 : index
    %0 = vector.load %arg1[%c0, %c0_0, %c0_1] : memref<2x32x256xf32, #tpu.memory_space<vmem>>, vector<2x32x256xf32>
    %cst = arith.constant dense<0.000000e+00> : vector<2x32xf32>
    %1 = vector.multi_reduction <add>, %0, %cst [2] : vector<2x32x256xf32> to vector<2x32xf32>
    %2 = vector.shape_cast %1 : vector<2x32xf32> to vector<2x32x1xf32>
    %cst_2 = arith.constant dense<0.000000e+00> : vector<32x1xf32>
    %3 = vector.multi_reduction <add>, %2, %cst_2 [0] : vector<2x32x1xf32> to vector<32x1xf32>
    %4 = vector.shape_cast %3 : vector<32x1xf32> to vector<1x32x1xf32>
    %cst_3 = arith.constant 0.001953125 : f32
    %5 = vector.broadcast %cst_3 : f32 to vector<1x32x1xf32>
    %6 = arith.mulf %4, %5 : vector<1x32x1xf32>
    %7 = vector.broadcast %6 : vector<1x32x1xf32> to vector<2x32x256xf32>
    %8 = arith.subf %0, %7 : vector<2x32x256xf32>
    %9 = arith.mulf %8, %8 : vector<2x32x256xf32>
    %cst_4 = arith.constant dense<0.000000e+00> : vector<2x32xf32>
    %10 = vector.multi_reduction <add>, %9, %cst_4 [2] : vector<2x32x256xf32> to vector<2x32xf32>
    %11 = vector.shape_cast %10 : vector<2x32xf32> to vector<2x32x1xf32>
    %cst_5 = arith.constant dense<0.000000e+00> : vector<32x1xf32>
    %12 = vector.multi_reduction <add>, %11, %cst_5 [0] : vector<2x32x1xf32> to vector<32x1xf32>
    %13 = vector.shape_cast %12 : vector<32x1xf32> to vector<1x32x1xf32>
    %cst_6 = arith.constant 0.001953125 : f32
    %14 = vector.broadcast %cst_6 : f32 to vector<1x32x1xf32>
    %15 = arith.mulf %13, %14 : vector<1x32x1xf32>
    %c0_7 = arith.constant 0 : index
    %c0_8 = arith.constant 0 : index
    %16 = vector.load %arg2[%c0_7, %c0_8] : memref<32x1xf32, #tpu.memory_space<vmem>>, vector<32x1xf32>
    %17 = vector.shape_cast %16 : vector<32x1xf32> to vector<1x32x1xf32>
    %cst_9 = arith.constant 9.99999974E-6 : f32
    %18 = vector.broadcast %cst_9 : f32 to vector<1x32x1xf32>
    %19 = arith.addf %15, %18 : vector<1x32x1xf32>
    %20 = math.rsqrt %19 : vector<1x32x1xf32>
    %21 = arith.mulf %17, %20 : vector<1x32x1xf32>
    %22 = vector.broadcast %21 : vector<1x32x1xf32> to vector<2x32x256xf32>
    %23 = arith.mulf %8, %22 : vector<2x32x256xf32>
    %c0_10 = arith.constant 0 : index
    %c0_11 = arith.constant 0 : index
    %24 = vector.load %arg3[%c0_10, %c0_11] : memref<32x1xf32, #tpu.memory_space<vmem>>, vector<32x1xf32>
    %25 = vector.shape_cast %24 : vector<32x1xf32> to vector<1x32x1xf32>
    %26 = vector.broadcast %25 : vector<1x32x1xf32> to vector<2x32x256xf32>
    %27 = arith.addf %23, %26 : vector<2x32x256xf32>
    %c0_12 = arith.constant 0 : index
    %c0_13 = arith.constant 0 : index
    %c0_14 = arith.constant 0 : index
    %28 = vector.load %arg4[%c0_12, %c0_13, %c0_14] : memref<2x32x256xf32, #tpu.memory_space<vmem>>, vector<2x32x256xf32>
    tpu.vector_store %arg4[%c0_12, %c0_13, %c0_14], %27 {strides = array<i32>} : memref<2x32x256xf32, #tpu.memory_space<vmem>>, vector<2x32x256xf32>,
    %29 = vector.shape_cast %6 : vector<1x32x1xf32> to vector<32x1xf32>
    %c0_15 = arith.constant 0 : index
    %c0_16 = arith.constant 0 : index
    %30 = vector.load %arg5[%c0_15, %c0_16] : memref<32x1xf32, #tpu.memory_space<vmem>>, vector<32x1xf32>
    tpu.vector_store %arg5[%c0_15, %c0_16], %29 {strides = array<i32>} : memref<32x1xf32, #tpu.memory_space<vmem>>, vector<32x1xf32>,
    %31 = vector.shape_cast %15 : vector<1x32x1xf32> to vector<32x1xf32>
    %c0_17 = arith.constant 0 : index
    %c0_18 = arith.constant 0 : index
    %32 = vector.load %arg6[%c0_17, %c0_18] : memref<32x1xf32, #tpu.memory_space<vmem>>, vector<32x1xf32>
    tpu.vector_store %arg6[%c0_17, %c0_18], %31 {strides = array<i32>} : memref<32x1xf32, #tpu.memory_space<vmem>>, vector<32x1xf32>,
    return
  }
  func.func @transform_0(%arg0: i32) -> (i32, i32, i32) {
    %c0_i32 = arith.constant 0 : i32
    %c0_i32_0 = arith.constant 0 : i32
    %c0_i32_1 = arith.constant 0 : i32
    return %c0_i32, %arg0, %c0_i32_0 : i32, i32, i32
  }
  func.func @transform_1(%arg0: i32) -> (i32, i32) {
    %c0_i32 = arith.constant 0 : i32
    %c0_i32_0 = arith.constant 0 : i32
    return %arg0, %c0_i32 : i32, i32
  }
  func.func @transform_2(%arg0: i32) -> (i32, i32) {
    %c0_i32 = arith.constant 0 : i32
    %c0_i32_0 = arith.constant 0 : i32
    return %arg0, %c0_i32 : i32, i32
  }
  func.func @transform_3(%arg0: i32) -> (i32, i32, i32) {
    %c0_i32 = arith.constant 0 : i32
    %c0_i32_0 = arith.constant 0 : i32
    %c0_i32_1 = arith.constant 0 : i32
    return %c0_i32, %arg0, %c0_i32_0 : i32, i32, i32
  }
  func.func @transform_4(%arg0: i32) -> (i32, i32) {
    %c0_i32 = arith.constant 0 : i32
    %c0_i32_0 = arith.constant 0 : i32
    return %arg0, %c0_i32 : i32, i32
  }
  func.func @transform_5(%arg0: i32) -> (i32, i32) {
    %c0_i32 = arith.constant 0 : i32
    %c0_i32_0 = arith.constant 0 : i32
    return %arg0, %c0_i32 : i32, i32
  }
}

</mosaic_0001>

<bundles_post_ra>
// kernel: tpu_custom_call.1
= control target key start
LH: loop header
LB: loop body
LE: loop exit
PB: predicated region body
PF: predicated region fallthrough
CT: control target
= control target key end

     0   :  { %11 = vsyncpa [#allocation3], 0  ;;  %s1266_s0 = inlined_call_operand.hbm [shape: f32[2,64,256], index: 0, kind: input, shape index: {}]   ;;  %s1267_s1 = inlined_call_operand.vmem [shape: f32[64,1], index: 1, kind: input, shape index: {}]   ;;  %s1268_s2 = inlined_call_operand.vmem [shape: f32[64,1], index: 2, kind: input, shape index: {}]   ;;  %s1269_s3 = inlined_call_operand.hbm [shape: f32[2,64,256], index: 3, kind: output, shape index: {0}]   ;;  %s1270_s4 = inlined_call_operand.vmem [shape: f32[64,1], index: 4, kind: output, shape index: {1}]   ;;  %s1271_s5 = inlined_call_operand.vmem [shape: f32[64,1], index: 5, kind: output, shape index: {2}]  }
   0x1   :  { %13 = vsyncpa [#allocation3 + $0x1], 0 }
   0x2   :  { %14 = vsyncpa [#allocation4], 0 }
   0x3   :  { %16 = vsyncpa [#allocation4 + $0x1], 0  ;;  %s972_s18 = smov 0   ;;  %s974_s19 = smov 0  }
   0x4   :  { %s976_s20 = smov 0   ;;  %s978_s21 = smov 0  }
   0x5 LB: > { %s993_s22 = sadd.s32 4294967295, %s926_s21   ;;  %s780_s23 = sadd.s32 4294967294, %s926_s21   ;;  %s926_s21 = sphi %s978_s21, %s1279_s21   ;;  %s922_s20 = sphi %s976_s20, %s1278_s20   ;;  %s918_s19 = sphi %s974_s19, %s1277_s19   ;;  %s914_s18 = sphi %s972_s18, %s1276_s18  }
   0x6   : > { %s997_s24 = sadd.s32 1, %s926_s21   ;;  %s29_s25 = sadd.s32 1, %s922_s20 }
   0x7   : > { %s26_s26 = ssub.s32 %s926_s21, %s997_s24  ;;  %p36_p0 = scmp.ne.s32.totalorder %s922_s20, %s918_s19 }
   0x8   : > { %p27_p1 = scmp.eq.s32.totalorder %s26_s26, 0  ;;  %p37_p2 = scmp.eq.s32.totalorder %s926_s21, 0 }
   0x9   : > { %p42_p3 = scmp.ne.s32.totalorder %s918_s19, %s914_s18  ;;  %p43_p4 = scmp.eq.s32.totalorder %s993_s22, 0 }
   0xa   : > { %s1009_s27 = scalar_select %p27_p1, %s922_s20, %s29_s25  }
   0xb   : > { %p1011_p5 = por %p37_p2, %p36_p0  ;;  %p1015_p6 = por %p43_p4, %p42_p3 }
   0xc   : > { %p118_p7 = scmp.eq.s32.totalorder %s993_s22, 1  ;;  %p124_p8 = scmp.eq.s32.totalorder %s780_s23, 1 }
   0xd   : > { %p782_p11 = scmp.ge.s32.totalorder %s926_s21, 2 }
   0xe   : > { %p1020_p9 = por %p118_p7, %p36_p0  ;;  %p1024_p10 = por %p124_p8, %p42_p3 }
   0xf   : > { %192 = sbr.rel (%p782_p11) target bundleno = 35 (0x23), region = 16 }
  0x16   : > { %s196_s7 = sand.u32 1, %s922_s20   ;;  %s807_s8 = sshll.u32 %s926_s21, 10 }
  0x17   : > { %s783_s9 = sshll.u32 %s196_s7, 7  ;;  %s207_s12 = scalar_lea.hbm %s1266_s0, %s807_s8 }
  0x18   : > { %s810_s13 = scalar_select %p1011_p5, [#allocation0], [#allocation10] }
  0x19   : > { %s200_s14 = scalar_lea.vmem [#allocation2], %s783_s9  ;;  %s928_s17 = smov 2048  }
  0x1a   : > { %s220_s15 = sshll.u32 %s200_s14, 4  ;;  %s212_s16 = sld [smem:[%s810_s13]]   ;;  %s221_s15 = int_to_ptr.vmem [resolvable:$true] %s220_s15 }
  0x1b   : > { %811 = sst [smem:[#allocation7]] (%p1011_p5), %s928_s17  ;;  %s929_s23 = smov 1024  }
  0x1c   : > { %812 = sst [smem:[#allocation7 + $0x1]] (%p1011_p5), %s929_s23  ;;  %s930_s25 = smov 4  }
  0x1d   : > { %813 = sst [smem:[#allocation7 + $0x2]] (%p1011_p5), %s930_s25  ;;  %s931_s26 = smov 256  }
  0x1e   : > { %814 = sst [smem:[#allocation7 + $0x3]] (%p1011_p5), %s931_s26  ;;  %s932_s9 = smov 16  }
  0x1f   : > { %815 = sst [smem:[#allocation7 + $0x4]] (%p1011_p5), %s931_s26  ;;  %s197_s11 = scalar_lea.sflag [#allocation3], %s196_s7 }
  0x20   : > { %s787_s8 = sshll.u32 %s212_s16, 26  ;;  %816 = sst [smem:[#allocation7 + $0x5]] (%p1011_p5), %s932_s9 }
  0x21   : > { %s788_s10 = sadd.s32 134217728, %s787_s8  ;;  %s933_s13 = smov [#allocation6]  }
  0x22   : > { %817 = dma.general (%p1011_p5), %s207_s12, 2048, %s221_s15, %s197_s11, %s933_s13, [#allocation7], %s788_s10, 0  }
  0x23 PF: > { %p789_p12 = scmp.ge.s32.totalorder %s926_s21, 1  ;;  %p259_p13 = scmp.lt.s32.totalorder %s926_s21, 3 }
  0x25   : > { %p260_p0 = pnand %p789_p12, %p259_p13 }
  0x26   : > { %s1055_s14 = sand.u32 (!%p260_p0), 1, %s918_s19  }
  0x27   : > { %263 = sbr.rel (%p260_p0) target bundleno = 533 (0x215), region = 32  ;;  %s790_s16 = sshll.u32 (!%p260_p0), %s1055_s14, 7 }
  0x28   : > { %s266_s17 = scalar_lea.sflag (!%p260_p0), [#allocation3], %s1055_s14  ;;  %s269_s7 = scalar_lea.vmem (!%p260_p0), [#allocation2], %s790_s16 }
  0x2e   : > { %905 = dma.done.wait (%p1015_p6), %s266_s17, 2048  }
  0x2f   : > { %907 = vsyncadd (%p1015_p6), %s266_s17, 4294965248  ;;  %v1065_v0 = vld [vmem:[%s269_s7 + $0x20] sm:$0xff]  ;;  %v1067_v1 = vld [vmem:[%s269_s7 + $0x28] sm:$0xff]  ;;  %s792_s28 = sshll.u32 %s993_s22, 2  ;;  %vm562_vm0 = vcmask 7168  }
  0x30   : > { %v342_v2 = vld [vmem:[%s269_s7] sm:$0xff]  ;;  %v364_v3 = vadd.f32 %v1067_v1, %v1065_v0  ;;  %v343_v4 = vld [vmem:[%s269_s7 + $0x8] sm:$0xff]  ;;  %v348_v5 = vld [vmem:[%s269_s7 + $0x30] sm:$0xff]  ;;  %p318_p1 = scmp.lt.s32.totalorder %s792_s28, 7 }
  0x31   : > { %v349_v6 = vld [vmem:[%s269_s7 + $0x38] sm:$0xff]  ;;  %v358_v7 = vadd.f32 %v343_v4, %v342_v2  ;;  %v344_v8 = vld [vmem:[%s269_s7 + $0x10] sm:$0xff]  ;;  %v350_v14 = vld [vmem:[%s269_s7 + $0x40] sm:$0xff] }
  0x32   : > { %v345_v9 = vld [vmem:[%s269_s7 + $0x18] sm:$0xff]  ;;  %365 = vadd.xlane.f32.xlu1 %v364_v3  ;;  %v367_v10 = vadd.f32 %v349_v6, %v348_v5  ;;  %v352_v12 = vld [vmem:[%s269_s7 + $0x50] sm:$0xff]  ;;  %v351_v15 = vld [vmem:[%s269_s7 + $0x48] sm:$0xff]  ;;  %s1281_s28 = smov (!%p318_p1, %s792_s28), 7 }
  0x33   : > { %359 = vadd.xlane.f32.xlu0 %v358_v7  ;;  %v361_v11 = vadd.f32 %v345_v9, %v344_v8  ;;  %v353_v13 = vld [vmem:[%s269_s7 + $0x58] sm:$0xff]  ;;  %v370_v17 = vadd.f32 %v351_v15, %v350_v14  ;;  %v1071_v18 = vld [vmem:[%s269_s7 + $0x70] sm:$0xff]  ;;  %v1075_v20 = vld [vmem:[%s269_s7 + $0x60] sm:$0xff]  ;;  %s1084_s29 = sshll.u32 %s1281_s28, 3  ;;  %s1202_s28 = scalar_lea.vmem [#allocation5], %s790_s16 }
  0x34   : > { %v373_v16 = vadd.f32 %v353_v13, %v352_v12  ;;  %v1073_v19 = vld [vmem:[%s269_s7 + $0x78] sm:$0xff]  ;;  %v1077_v21 = vld [vmem:[%s269_s7 + $0x68] sm:$0xff]  ;;  %s1090_s23 = scalar_lea.vmem %s1270_s4, %s1084_s29  ;;  %s1174_s8 = scalar_lea.vmem %s1268_s2, %s1084_s29 }
  0x35   : > { %v379_v22 = vadd.f32 %v1073_v19, %v1071_v18  ;;  %v376_v23 = vadd.f32 %v1077_v21, %v1075_v20  ;;  %s340_s11 = scalar_lea.vmem %s1271_s5, %s1084_s29  ;;  %s321_s7 = scalar_lea.vmem %s1267_s1, %s1084_s29 }
  0x36   : > { %368 = vadd.xlane.f32.xlu1 %v367_v10  ;;  %s572_s16 = scalar_lea.sflag [#allocation4], %s1055_s14 }
  0x37   : > { %362 = vadd.xlane.f32.xlu0 %v361_v11 }
  0x3a   : > { %374 = vadd.xlane.f32.xlu1 %v373_v16  ;;  %v934_v16 = vmov 0  }
  0x3b   : > { %371 = vadd.xlane.f32.xlu0 %v370_v17  ;;  %879 = vset.pattern.permute.xlu1 %v934_v16  ;;  %v506_v17 = vld [vmem:[%s1174_s8] sm:$0xff] }
  0x3c   : > { %878 = vset.pattern.permute.xlu0 %v934_v16 }
  0x3e   : > { %380 = vadd.xlane.f32.xlu1 %v379_v22 }
  0x3f   : > { %377 = vadd.xlane.f32.xlu0 %v376_v23 }
  0xbf   : > { %v366_v24 = vpop.xlane.xlu1 %365 }
  0xc0   : > { %v360_v25 = vpop.xlane.xlu0 %359 }
  0xc3   : > { %v369_v26 = vpop.xlane.xlu1 %368 }
  0xc4   : > { %v363_v27 = vpop.xlane.xlu0 %362 }
  0xc7   : > { %v375_v28 = vpop.xlane.xlu1 %374 }
  0xc8   : > { %v383_v29 = vadd.f32 %v375_v28, %v363_v27  ;;  %v372_v30 = vpop.xlane.xlu0 %371 }
  0xc9   : > { %v382_v31 = vadd.f32 %v372_v30, %v360_v25 }
  0xca   : > { %v387_v32 = vmul.f32 0.001953125, %v383_v29 }
  0xcb   : > { %v386_v33 = vmul.f32 0.001953125, %v382_v31  ;;  %v381_v34 = vpop.xlane.xlu1 %380 }
  0xcc   : > { %v385_v35 = vadd.f32 %v381_v34, %v369_v26  ;;  %v378_v36 = vpop.xlane.xlu0 %377  ;;  %v1092_v37 = vsub.f32 %v344_v8, %v387_v32  ;;  %v1094_v38 = vsub.f32 %v345_v9, %v387_v32  ;;  %v1106_v45 = vsub.f32 %v352_v12, %v387_v32  ;;  %564 = vst.msk [vmem:[%s1090_s23 + $0x8] sm:$0xff] %vm562_vm0, %v387_v32 }
  0xcd   : > { %v384_v39 = vadd.f32 %v378_v36, %v366_v24  ;;  %v1096_v40 = vsub.f32 %v342_v2, %v386_v33  ;;  %v1098_v41 = vsub.f32 %v343_v4, %v386_v33  ;;  %563 = vst.msk [vmem:[%s1090_s23] sm:$0xff] %vm562_vm0, %v386_v33  ;;  %v1114_v49 = vsub.f32 %v353_v13, %v387_v32 }
  0xce   : > { %v389_v42 = vmul.f32 0.001953125, %v385_v35  ;;  %v408_v43 = vmul.f32 %v1092_v37, %v1092_v37  ;;  %v409_v44 = vmul.f32 %v1094_v38, %v1094_v38  ;;  %v1120_v53 = vsub.f32 %v350_v14, %v386_v33 }
  0xcf   : > { %v388_v46 = vmul.f32 0.001953125, %v384_v39  ;;  %v406_v47 = vmul.f32 %v1096_v40, %v1096_v40  ;;  %v407_v48 = vmul.f32 %v1098_v41, %v1098_v41  ;;  %v1134_v59 = vsub.f32 %v351_v15, %v386_v33 }
  0xd0   : > { %v425_v50 = vadd.f32 %v409_v44, %v408_v43  ;;  %v1116_v51 = vsub.f32 %v348_v5, %v389_v42  ;;  %v1118_v52 = vsub.f32 %v349_v6, %v389_v42  ;;  %566 = vst.msk [vmem:[%s1090_s23 + $0x18] sm:$0xff] %vm562_vm0, %v389_v42  ;;  %v416_v62 = vmul.f32 %v1106_v45, %v1106_v45  ;;  %v455_v44 = vld [vmem:[%s321_s7 + $0x8] sm:$0xff] }
  0xd1   : > { %v422_v54 = vadd.f32 %v407_v48, %v406_v47  ;;  %v1123_v55 = vsub.f32 %v1065_v0, %v388_v46  ;;  %v1126_v56 = vsub.f32 %v1067_v1, %v388_v46  ;;  %565 = vst.msk [vmem:[%s1090_s23 + $0x10] sm:$0xff] %vm562_vm0, %v388_v46  ;;  %v417_v63 = vmul.f32 %v1114_v49, %v1114_v49 }
  0xd2   : > { %426 = vadd.xlane.f32.xlu1 %v425_v50  ;;  %v412_v57 = vmul.f32 %v1116_v51, %v1116_v51  ;;  %v413_v58 = vmul.f32 %v1118_v52, %v1118_v52  ;;  %v414_v1 = vmul.f32 %v1120_v53, %v1120_v53  ;;  %v1149_v2 = vsub.f32 %v1071_v18, %v389_v42  ;;  %v507_v18 = vld [vmem:[%s1174_s8 + $0x8] sm:$0xff] }
  0xd3   : > { %423 = vadd.xlane.f32.xlu0 %v422_v54  ;;  %v410_v60 = vmul.f32 %v1123_v55, %v1123_v55  ;;  %v411_v61 = vmul.f32 %v1126_v56, %v1126_v56  ;;  %v1152_v3 = vsub.f32 %v1073_v19, %v389_v42  ;;  %v415_v5 = vmul.f32 %v1134_v59, %v1134_v59  ;;  %v508_v19 = vld [vmem:[%s1174_s8 + $0x10] sm:$0xff] }
  0xd4   : > { %v431_v0 = vadd.f32 %v413_v58, %v412_v57  ;;  %v1157_v6 = vsub.f32 %v1075_v20, %v388_v46  ;;  %v1160_v7 = vsub.f32 %v1077_v21, %v388_v46  ;;  %v437_v8 = vadd.f32 %v417_v63, %v416_v62  ;;  %v454_v46 = vld [vmem:[%s321_s7] sm:$0xff]  ;;  %v456_v57 = vld [vmem:[%s321_s7 + $0x10] sm:$0xff]  ;;  %v457_v62 = vld [vmem:[%s321_s7 + $0x18] sm:$0xff] }
  0xd5   : > { %v428_v4 = vadd.f32 %v411_v61, %v410_v60  ;;  %v420_v9 = vmul.f32 %v1149_v2, %v1149_v2  ;;  %v421_v10 = vmul.f32 %v1152_v3, %v1152_v3  ;;  %v434_v11 = vadd.f32 %v415_v5, %v414_v1 }
  0xd6   : > { %432 = vadd.xlane.f32.xlu1 %v431_v0  ;;  %v418_v12 = vmul.f32 %v1157_v6, %v1157_v6  ;;  %v419_v13 = vmul.f32 %v1160_v7, %v1160_v7  ;;  %v509_v0 = vld [vmem:[%s1174_s8 + $0x18] sm:$0xff] }
  0xd7   : > { %429 = vadd.xlane.f32.xlu0 %v428_v4  ;;  %v443_v14 = vadd.f32 %v421_v10, %v420_v9 }
  0xd8   : > { %v440_v15 = vadd.f32 %v419_v13, %v418_v12 }
  0xda   : > { %438 = vadd.xlane.f32.xlu1 %v437_v8 }
  0xdb   : > { %435 = vadd.xlane.f32.xlu0 %v434_v11 }
  0xde   : > { %444 = vadd.xlane.f32.xlu1 %v443_v14 }
  0xdf   : > { %441 = vadd.xlane.f32.xlu0 %v440_v15 }
  0xef   : > { %512 = vperm.xlu1 %879, %v506_v17  }
  0xf3   : > { %517 = vperm.xlu1 %879, %v507_v18  }
  0xf7   : > { %522 = vperm.xlu1 %879, %v508_v19  }
 0x15f   : > { %v427_v20 = vpop.xlane.xlu1 %426 }
 0x160   : > { %v424_v21 = vpop.xlane.xlu0 %423 }
 0x163   : > { %v433_v22 = vpop.xlane.xlu1 %432 }
 0x164   : > { %v430_v23 = vpop.xlane.xlu0 %429 }
 0x167   : > { %v439_v24 = vpop.xlane.xlu1 %438 }
 0x168   : > { %v447_v25 = vadd.f32 %v439_v24, %v427_v20  ;;  %v436_v26 = vpop.xlane.xlu0 %435 }
 0x169   : > { %v446_v27 = vadd.f32 %v436_v26, %v424_v21 }
 0x16a   : > { %v451_v28 = vmul.f32 0.001953125, %v447_v25 }
 0x16b   : > { %v450_v29 = vmul.f32 0.001953125, %v446_v27  ;;  %v445_v30 = vpop.xlane.xlu1 %444 }
 0x16c   : > { %v459_v31 = vadd.f32 1e-05, %v451_v28  ;;  %v449_v32 = vadd.f32 %v445_v30, %v433_v22  ;;  %v442_v33 = vpop.xlane.xlu0 %441  ;;  %568 = vst.msk [vmem:[%s340_s11 + $0x8] sm:$0xff] %vm562_vm0, %v451_v28 }
 0x16d   : > { %v458_v34 = vadd.f32 1e-05, %v450_v29  ;;  %567 = vst.msk [vmem:[%s340_s11] sm:$0xff] %vm562_vm0, %v450_v29  ;;  %v448_v35 = vadd.f32 %v442_v33, %v430_v23 }
 0x16e   : > { %880 = vrsqrt.f32 %v459_v31  ;;  %v453_v36 = vmul.f32 0.001953125, %v449_v32 }
 0x16f   : > { %882 = vrsqrt.f32 %v458_v34  ;;  %v452_v39 = vmul.f32 0.001953125, %v448_v35  ;;  %v513_v1 = vpop.permute.xlu1 %512 }
 0x170   : > { %v461_v42 = vadd.f32 1e-05, %v453_v36  ;;  %570 = vst.msk [vmem:[%s340_s11 + $0x18] sm:$0xff] %vm562_vm0, %v453_v36 }
 0x171   : > { %v460_v43 = vadd.f32 1e-05, %v452_v39  ;;  %569 = vst.msk [vmem:[%s340_s11 + $0x10] sm:$0xff] %vm562_vm0, %v452_v39 }
 0x173   : > { %884 = vrsqrt.f32 %v460_v43  ;;  %v518_v4 = vpop.permute.xlu1 %517 }
 0x174   : > { %886 = vrsqrt.f32 %v461_v42 }
 0x177   : > { %v523_v5 = vpop.permute.xlu1 %522 }
 0x178   : > { %v881_v47 = vpop.eup %880 }
 0x179   : > { %v883_v48 = vpop.eup %882  ;;  %v467_v50 = vmul.f32 %v881_v47, %v455_v44 }
 0x17a   : > { %v466_v54 = vmul.f32 %v883_v48, %v454_v46 }
 0x17b   : > { %477 = vperm.xlu1 %879, %v467_v50  }
 0x17c   : > { %472 = vperm.xlu0 %878, %v466_v54  }
 0x17d   : > { %v885_v58 = vpop.eup %884 }
 0x17e   : > { %v468_v60 = vmul.f32 %v885_v58, %v456_v57  ;;  %v887_v61 = vpop.eup %886 }
 0x17f   : > { %v469_v63 = vmul.f32 %v887_v61, %v457_v62 }
 0x180   : > { %482 = vperm.xlu1 %879, %v468_v60  }
 0x184   : > { %487 = vperm.xlu1 %879, %v469_v63  }
 0x188   : > { %527 = vperm.xlu1 %879, %v509_v0  }
 0x1fa   : > { %v478_v8 = vpop.permute.xlu1 %477 }
 0x1fb   : > { %v492_v9 = vmul.f32 %v478_v8, %v1092_v37  ;;  %v493_v10 = vmul.f32 %v478_v8, %v1094_v38  ;;  %v500_v11 = vmul.f32 %v478_v8, %v1106_v45  ;;  %v501_v12 = vmul.f32 %v478_v8, %v1114_v49  ;;  %v473_v13 = vpop.permute.xlu0 %472 }
 0x1fc   : > { %v490_v14 = vmul.f32 %v473_v13, %v1096_v40  ;;  %v491_v15 = vmul.f32 %v473_v13, %v1098_v41  ;;  %v498_v16 = vmul.f32 %v473_v13, %v1120_v53  ;;  %v499_v17 = vmul.f32 %v473_v13, %v1134_v59 }
 0x1fd   : > { %v532_v18 = vadd.f32 %v518_v4, %v492_v9  ;;  %v533_v19 = vadd.f32 %v518_v4, %v493_v10  ;;  %v540_v20 = vadd.f32 %v518_v4, %v500_v11  ;;  %v541_v37 = vadd.f32 %v518_v4, %v501_v12 }
 0x1fe   : > { %v530_v21 = vadd.f32 %v513_v1, %v490_v14  ;;  %v531_v38 = vadd.f32 %v513_v1, %v491_v15  ;;  %v538_v22 = vadd.f32 %v513_v1, %v498_v16  ;;  %v539_v23 = vadd.f32 %v513_v1, %v499_v17 }
 0x1ff   : > { %548 = vst [vmem:[%s1202_s28 + $0x10] sm:$0xff] %v532_v18  ;;  %549 = vst [vmem:[%s1202_s28 + $0x18] sm:$0xff] %v533_v19  ;;  %v483_v40 = vpop.permute.xlu1 %482 }
 0x200   : > { %556 = vst [vmem:[%s1202_s28 + $0x50] sm:$0xff] %v540_v20  ;;  %557 = vst [vmem:[%s1202_s28 + $0x58] sm:$0xff] %v541_v37  ;;  %v494_v41 = vmul.f32 %v483_v40, %v1123_v55  ;;  %v495_v45 = vmul.f32 %v483_v40, %v1126_v56  ;;  %v502_v49 = vmul.f32 %v483_v40, %v1157_v6 }
 0x201   : > { %546 = vst [vmem:[%s1202_s28] sm:$0xff] %v530_v21  ;;  %547 = vst [vmem:[%s1202_s28 + $0x8] sm:$0xff] %v531_v38  ;;  %v503_v53 = vmul.f32 %v483_v40, %v1160_v7 }
 0x202   : > { %554 = vst [vmem:[%s1202_s28 + $0x40] sm:$0xff] %v538_v22  ;;  %555 = vst [vmem:[%s1202_s28 + $0x48] sm:$0xff] %v539_v23  ;;  %v534_v59 = vadd.f32 %v523_v5, %v494_v41  ;;  %v535_v24 = vadd.f32 %v523_v5, %v495_v45  ;;  %v542_v25 = vadd.f32 %v523_v5, %v502_v49 }
 0x203   : > { %v543_v26 = vadd.f32 %v523_v5, %v503_v53  ;;  %v488_v27 = vpop.permute.xlu1 %487 }
 0x204   : > { %550 = vst [vmem:[%s1202_s28 + $0x20] sm:$0xff] %v534_v59  ;;  %551 = vst [vmem:[%s1202_s28 + $0x28] sm:$0xff] %v535_v24  ;;  %v496_v55 = vmul.f32 %v488_v27, %v1116_v51  ;;  %v497_v56 = vmul.f32 %v488_v27, %v1118_v52  ;;  %v504_v6 = vmul.f32 %v488_v27, %v1149_v2 }
 0x205   : > { %558 = vst [vmem:[%s1202_s28 + $0x60] sm:$0xff] %v542_v25  ;;  %559 = vst [vmem:[%s1202_s28 + $0x68] sm:$0xff] %v543_v26  ;;  %v505_v7 = vmul.f32 %v488_v27, %v1152_v3 }
 0x207   : > { %v528_v28 = vpop.permute.xlu1 %527 }
 0x208   : > { %v536_v29 = vadd.f32 %v528_v28, %v496_v55  ;;  %v537_v30 = vadd.f32 %v528_v28, %v497_v56  ;;  %v544_v31 = vadd.f32 %v528_v28, %v504_v6  ;;  %v545_v32 = vadd.f32 %v528_v28, %v505_v7 }
 0x20a   : > { %552 = vst [vmem:[%s1202_s28 + $0x30] sm:$0xff] %v536_v29  ;;  %553 = vst [vmem:[%s1202_s28 + $0x38] sm:$0xff] %v537_v30 }
 0x20b   : > { %560 = vst [vmem:[%s1202_s28 + $0x70] sm:$0xff] %v544_v31  ;;  %561 = vst [vmem:[%s1202_s28 + $0x78] sm:$0xff] %v545_v32 }
 0x20c   : > { %s809_s29 = sshll.u32 %s993_s22, 10  ;;  %s612_s12 = sshll.u32 %s1202_s28, 4  ;;  %s613_s12 = int_to_ptr.vmem [resolvable:$true] %s612_s12 }
 0x20d   : > { %s595_s25 = scalar_lea.hbm %s1269_s3, %s809_s29  ;;  %s935_s26 = smov 1024  }
 0x20e   : > { %819 = sst [smem:[#allocation9]] (%p1020_p9), %s935_s26  ;;  %s936_s14 = smov 2048  }
 0x20f   : > { %820 = sst [smem:[#allocation9 + $0x1]] (%p1020_p9), %s936_s14  ;;  %s937_s8 = smov 4  }
 0x210   : > { %821 = sst [smem:[#allocation9 + $0x2]] (%p1020_p9), %s937_s8  ;;  %s938_s9 = smov 256  }
 0x211   : > { %822 = sst [smem:[#allocation9 + $0x3]] (%p1020_p9), %s938_s9  ;;  %s939_s22 = smov 16  }
 0x212   : > { %823 = sst [smem:[#allocation9 + $0x4]] (%p1020_p9), %s938_s9  ;;  %s940_s10 = smov [#allocation8]  }
 0x213   : > { %824 = sst [smem:[#allocation9 + $0x5]] (%p1020_p9), %s939_s22  ;;  %s941_s11 = smov 0  }
 0x214   : > { %825 = dma.general (%p1020_p9), %s613_s12, 2048, %s595_s25, %s572_s16, %s940_s10, [#allocation9], %s941_s11, 0  }
 0x215 PF: > { %s648_s13 = sand.u32 1, %s914_s18   ;;  %p828_p2 = pnand %p782_p11, %p1024_p10 }
 0x216   : > { %s649_s17 = scalar_lea.sflag [#allocation4], %s648_s13 }
 0x217   : > { %909 = dma.done.wait (!%p828_p2), %s649_s17, 2048  }
 0x218   : > { %911 = vsyncadd (!%p828_p2), %s649_s17, 4294965248  ;;  %p19_p3 = scmp.ge.s32.totalorder %s997_s24, 4   ;;  %s1276_s18 = smov %s918_s19 }
 0x219   : > { %s1277_s19 = smov %s922_s20  ;;  %s1278_s20 = smov %s1009_s27 }
 0x21a   : > { %s1279_s21 = smov %s997_s24  ;;  %21 = sbr.rel (!%p19_p3) target bundleno = 5 (0x5), region = 117 }
 0x221   :  { %670 = vsyncpa [#allocation3], 1 }
 0x222   :  { %672 = vsyncpa [#allocation3 + $0x1], 1 }
 0x223   :  { %673 = vsyncpa [#allocation4], 1 }
 0x224   :  { %675 = vsyncpa [#allocation4 + $0x1], 1 }

</bundles_post_ra>
